<compile_context>
chip_gen: v7x
topology: tpu7x:2x2x1
jax: 0.10.0
libtpu: 0.0.40
codegen_flags: <defaults>
</compile_context>

<pallas_src>
import jax
import jax.numpy as jnp
from jax.experimental import pallas as pl
from jax.experimental.pallas import tpu as pltpu


def _round_up(x, m):
    return ((x + m - 1) // m) * m


def _choose_tm(m, tm_max):
    """Pick the token tile: 16-granular single block for tiny M, otherwise the
    largest 128-granular tile <= tm_max that minimizes M-padding waste."""
    if m <= 128:
        return _round_up(m, 16)
    best_tm, best_mp = 128, _round_up(m, 128)
    tm = 128
    while tm <= tm_max:
        mp = _round_up(m, tm)
        if mp <= best_mp:          # ties -> larger tile
            best_tm, best_mp = tm, mp
        tm += 128
    return best_tm


# ---------------------------------------------------------------------------
# Fused LoRA linear:  out = (x @ W + (x @ A) @ (scaling * B)) [* mask]
#   x@A is precomputed outside the grid (hoisted); the kernel only streams
#   x and W over the k axis and applies the rank-r correction at finalize.
# ---------------------------------------------------------------------------
def _make_lora_kernel(use_mask):
    def kernel(*refs):
        if use_mask:
            x_ref, w_ref, xa_ref, b_ref, m_ref, o_ref, acc_ref = refs
        else:
            x_ref, w_ref, xa_ref, b_ref, o_ref, acc_ref = refs

        k = pl.program_id(2)

        @pl.when(k == 0)
        def _():
            acc_ref[...] = jnp.zeros_like(acc_ref)

        # Base branch: accumulate x_k @ W_k in fp32 on the MXU.
        acc_ref[...] += jnp.dot(x_ref[...], w_ref[...],
                                preferred_element_type=jnp.float32)

        @pl.when(k == pl.num_programs(2) - 1)
        def _():
            # LoRA correction: (x @ A) @ B, both bf16, fp32 accumulation.
            # B already carries the alpha/r scaling.
            lora = jnp.dot(xa_ref[...], b_ref[...],
                           preferred_element_type=jnp.float32)
            y = acc_ref[...] + lora
            if use_mask:
                y = y * m_ref[...]
            o_ref[...] = y.astype(o_ref.dtype)

    return kernel


def prepare_lora_weights(w_t, a_t, b_t, *, scaling, rank_pad=16):
    """One-time weight prep: bf16 cast, fold scaling into B, pad rank to 16."""
    r = a_t.shape[1]
    r_pad = _round_up(max(r, rank_pad), rank_pad)
    w_p = w_t.astype(jnp.bfloat16)
    a_p = jnp.pad(a_t, ((0, 0), (0, r_pad - r))).astype(jnp.bfloat16)
    b_p = jnp.pad(b_t * scaling, ((0, r_pad - r), (0, 0))).astype(jnp.bfloat16)
    return w_p, a_p, b_p


def lora_linear(x, w_p, a_p, b_p, mask=None, *, tm=512, tn=512, tk=1024,
                out_dtype=jnp.float32, vmem_limit_bytes=48 * 1024 * 1024):
    """out = (x @ w_p + (x @ a_p) @ b_p) [* mask], tiled over (M, O, H).

    x: (M, H); w_p: (H, O) bf16; a_p: (H, r_pad) bf16; b_p: (r_pad, O) bf16
    (alpha/r folded in).  mask (optional): (M,) or (M, 1).
    """
    M, H = x.shape
    O = w_p.shape[1]
    r_pad = a_p.shape[1]

    tn = min(tn, O)
    tk = min(tk, H)
    assert O % tn == 0 and H % tk == 0, "H/O must divide the N/K tiles"

    tm = _choose_tm(M, tm)
    Mp = _round_up(M, tm)

    x_bf = x.astype(jnp.bfloat16)
    # Hoisted LoRA down-projection: tiny (M, r_pad), computed ONCE instead of
    # redundantly for every output-column tile inside the k loop.  Plain-XLA
    # glue (rank-16 class matmul); result fed bf16 to halve its DMA footprint.
    xa = jnp.dot(x_bf, a_p,
                 preferred_element_type=jnp.float32).astype(jnp.bfloat16)

    if Mp != M:
        x_bf = jnp.pad(x_bf, ((0, Mp - M), (0, 0)))
        xa = jnp.pad(xa, ((0, Mp - M), (0, 0)))

    use_mask = mask is not None
    in_specs = [
        pl.BlockSpec((tm, tk), lambda i, j, k: (i, k)),      # x (bf16)
        pl.BlockSpec((tk, tn), lambda i, j, k: (k, j)),      # W (bf16)
        pl.BlockSpec((tm, r_pad), lambda i, j, k: (i, 0)),   # x@A (bf16)
        pl.BlockSpec((r_pad, tn), lambda i, j, k: (0, j)),   # B (bf16, scaled)
    ]
    args = [x_bf, w_p, xa, b_p]
    if use_mask:
        m = mask.reshape(M, 1).astype(jnp.float32)
        if Mp != M:
            m = jnp.pad(m, ((0, Mp - M), (0, 0)))
        in_specs.append(pl.BlockSpec((tm, 1), lambda i, j, k: (i, 0)))
        args.append(m)

    out = pl.pallas_call(
        _make_lora_kernel(use_mask),
        out_shape=jax.ShapeDtypeStruct((Mp, O), out_dtype),
        grid_spec=pltpu.PrefetchScalarGridSpec(
            num_scalar_prefetch=0,
            grid=(Mp // tm, O // tn, H // tk),
            in_specs=in_specs,
            out_specs=pl.BlockSpec((tm, tn), lambda i, j, k: (i, j)),
            scratch_shapes=[pltpu.VMEM((tm, tn), jnp.float32)],  # fp32 acc
        ),
        compiler_params=pltpu.CompilerParams(
            # xa is precomputed, so i and j stay "parallel" (v7x 2-TC sharding).
            dimension_semantics=("parallel", "parallel", "arbitrary"),
            vmem_limit_bytes=vmem_limit_bytes),
    )(*args)
    return out[:M]


# ---------------------------------------------------------------------------
# Tiled bf16 matmul (used for the lm_head projection)
# ---------------------------------------------------------------------------
def _matmul_kernel(x_ref, w_ref, o_ref, acc_ref):
    @pl.when(pl.program_id(2) == 0)
    def _():
        acc_ref[...] = jnp.zeros_like(acc_ref)

    acc_ref[...] += jnp.dot(x_ref[...], w_ref[...],
                            preferred_element_type=jnp.float32)

    @pl.when(pl.program_id(2) == pl.num_programs(2) - 1)
    def _():
        o_ref[...] = acc_ref[...].astype(o_ref.dtype)


def tiled_matmul(x, w, *, tm=512, tn=512, tk=1024, out_dtype=jnp.bfloat16,
                 vmem_limit_bytes=48 * 1024 * 1024):
    M, K = x.shape
    Kw, N = w.shape
    assert K == Kw
    tn = min(tn, N)
    tk = min(tk, K)
    assert N % tn == 0 and K % tk == 0
    tm = _choose_tm(M, tm)
    Mp = _round_up(M, tm)

    x = x.astype(jnp.bfloat16)
    w = w.astype(jnp.bfloat16)
    if Mp != M:
        x = jnp.pad(x, ((0, Mp - M), (0, 0)))

    out = pl.pallas_call(
        _matmul_kernel,
        out_shape=jax.ShapeDtypeStruct((Mp, N), out_dtype),
        grid_spec=pltpu.PrefetchScalarGridSpec(
            num_scalar_prefetch=0,
            grid=(Mp // tm, N // tn, K // tk),
            in_specs=[
                pl.BlockSpec((tm, tk), lambda i, j, k: (i, k)),
                pl.BlockSpec((tk, tn), lambda i, j, k: (k, j)),
            ],
            out_specs=pl.BlockSpec((tm, tn), lambda i, j, k: (i, j)),
            scratch_shapes=[pltpu.VMEM((tm, tn), jnp.float32)],
        ),
        compiler_params=pltpu.CompilerParams(
            dimension_semantics=("parallel", "parallel", "arbitrary"),
            vmem_limit_bytes=vmem_limit_bytes),
    )(x, w)
    return out[:M]


# ---------------------------------------------------------------------------
# Synthetic stand-in for the PEFT-wrapped base model
# ---------------------------------------------------------------------------
class LoraModelJax:
    """forward(input_ids) -> logits (B, S, vocab); the hidden projection is a
    LoRA-adapted linear computed by the fused Pallas kernel."""

    def __init__(self, key, vocab=128, hidden=128, rank=8, lora_alpha=16):
        self.vocab = vocab
        self.hidden = hidden
        self.rank = rank
        self.scaling = float(lora_alpha) / float(rank)

        k_emb, k_w, k_a, k_b, k_head = jax.random.split(key, 5)
        self.embedding = jax.random.normal(k_emb, (vocab, hidden), jnp.float32) * 0.02
        # base linear weight, stored (in, out)
        self.w_t = jax.random.normal(k_w, (hidden, hidden), jnp.float32) * 0.02
        # LoRA adapters (PEFT inits lora_B to zero; small random values so the
        # low-rank path is numerically exercised — init is deterministic).
        self.a_t = jax.random.normal(k_a, (hidden, rank), jnp.float32) * 0.02
        self.b_t = jax.random.normal(k_b, (rank, hidden), jnp.float32) * 0.02
        # untied lm_head
        self.lm_head = jax.random.normal(k_head, (hidden, vocab), jnp.float32) * 0.02

        # One-time kernel-friendly weight prep: bf16 cast, scaling folded into
        # B, rank padded to 16 for bf16 sublane packing.
        self.w_p, self.a_p, self.b_p = prepare_lora_weights(
            self.w_t, self.a_t, self.b_t, scaling=self.scaling)
        self.lm_head_p = self.lm_head.astype(jnp.bfloat16)

    def forward(self, input_ids=None, attention_mask=None, inputs_embeds=None,
                labels=None, **kwargs):
        if inputs_embeds is None:
            inputs_embeds = self.embedding[input_ids]          # (B, S, H) glue
        B, S, H = inputs_embeds.shape
        x = inputs_embeds.reshape(B * S, H)

        mask = None
        if attention_mask is not None:
            mask = attention_mask.reshape(B * S, 1)

        # TODO(synk): lora_dropout on the adapter branch is identity in eval
        # mode; training-mode dropout is not implemented.
        h = lora_linear(x, self.w_p, self.a_p, self.b_p, mask=mask,
                        out_dtype=jnp.bfloat16)

        # bf16 logits halve the lm_head writeback at realistic vocab sizes.
        # TODO(synk): fusing the logsumexp / log-softmax reduction into the
        # lm_head finalize would remove the logits HBM round-trip entirely.
        logits = tiled_matmul(h, self.lm_head_p,
                              out_dtype=jnp.bfloat16).reshape(B, S, self.vocab)

        out = {"logits": logits}
        if labels is not None:                                  # glue
            logp = jax.nn.log_softmax(logits.astype(jnp.float32), axis=-1)
            nll = -jnp.take_along_axis(logp, labels[..., None], axis=-1)[..., 0]
            out["loss"] = jnp.mean(nll)
        return out


if __name__ == "__main__":
    key = jax.random.PRNGKey(0)
    model = LoraModelJax(key, vocab=128, hidden=128, rank=8, lora_alpha=16)

    B, S = 2, 8
    k_ids, k_lbl = jax.random.split(jax.random.PRNGKey(0))
    input_ids = jax.random.randint(k_ids, (B, S), 0, model.vocab)
    attention_mask = jnp.ones((B, S), jnp.int32)
    labels = jax.random.randint(k_lbl, (B, S), 0, model.vocab)

    out = model.forward(input_ids=input_ids, attention_mask=attention_mask,
                        labels=labels)
    jax.block_until_ready(out["logits"])
    jax.block_until_ready(out["loss"])

    # Reference check (pure JAX, fp32 math replicating the kernel's bf16
    # rounding points) for the fused LoRA-linear hot path.
    x_tok = model.embedding[input_ids].reshape(B * S, -1)
    hi = jax.lax.Precision.HIGHEST
    x32 = x_tok.astype(jnp.bfloat16).astype(jnp.float32)
    w32 = model.w_p.astype(jnp.float32)
    a32 = model.a_p.astype(jnp.float32)
    b32 = model.b_p.astype(jnp.float32)
    xa32 = jnp.dot(x32, a32, precision=hi).astype(jnp.bfloat16).astype(jnp.float32)
    ref = jnp.dot(x32, w32, precision=hi) + jnp.dot(xa32, b32, precision=hi)
    got = lora_linear(x_tok, model.w_p, model.a_p, model.b_p,
                      out_dtype=jnp.float32)
    assert jnp.allclose(got, ref, atol=2e-4, rtol=1e-3), "mismatch vs reference"

    print("KERNEL_OK")
</pallas_src>

<mosaic_0001>
module attributes {stable_mosaic.version = 11 : i64} {
  func.func @kernel(%arg0: i32, %arg1: i32, %arg2: i32, %arg3: memref<16x128xbf16, #tpu.memory_space<vmem>>, %arg4: memref<128x128xbf16, #tpu.memory_space<vmem>>, %arg5: memref<16x16xbf16, #tpu.memory_space<vmem>>, %arg6: memref<16x128xbf16, #tpu.memory_space<vmem>>, %arg7: memref<16x1xf32, #tpu.memory_space<vmem>>, %arg8: memref<16x128xbf16, #tpu.memory_space<vmem>>, %arg9: memref<16x128xf32, #tpu.memory_space<vmem>>) attributes {dimension_semantics = [#tpu.dimension_semantics<parallel>, #tpu.dimension_semantics<parallel>, #tpu.dimension_semantics<arbitrary>], iteration_bounds = array<i64: 1, 1, 1>, scalar_prefetch = 0 : i64, scratch_operands = 1 : i64, tpu.core_type = #tpu.core_type<tc>, window_params = [{transform_indices = @transform_0, window_bounds = array<i64: 16, 128>}, {transform_indices = @transform_1, window_bounds = array<i64: 128, 128>}, {transform_indices = @transform_2, window_bounds = array<i64: 16, 16>}, {transform_indices = @transform_3, window_bounds = array<i64: 16, 128>}, {transform_indices = @transform_4, window_bounds = array<i64: 16, 1>}, {transform_indices = @transform_5, window_bounds = array<i64: 16, 128>}]} {
    %c0_i32 = arith.constant 0 : i32
    %0 = arith.cmpi eq, %arg2, %c0_i32 : i32
    %1 = arith.extui %0 : i1 to i32
    %c0_i32_0 = arith.constant 0 : i32
    %2 = arith.cmpi ne, %1, %c0_i32_0 : i32
    scf.if %2 {
      %cst_10 = arith.constant 0.000000e+00 : f32
      %12 = vector.broadcast %cst_10 : f32 to vector<16x128xf32>
      %c0_11 = arith.constant 0 : index
      %c0_12 = arith.constant 0 : index
      %13 = vector.load %arg9[%c0_11, %c0_12] : memref<16x128xf32, #tpu.memory_space<vmem>>, vector<16x128xf32>
      tpu.vector_store %arg9[%c0_11, %c0_12], %12 {strides = array<i32>} : memref<16x128xf32, #tpu.memory_space<vmem>>, vector<16x128xf32>,
    } else {
    }
    %c0 = arith.constant 0 : index
    %c0_1 = arith.constant 0 : index
    %3 = vector.load %arg9[%c0, %c0_1] : memref<16x128xf32, #tpu.memory_space<vmem>>, vector<16x128xf32>
    %c0_2 = arith.constant 0 : index
    %c0_3 = arith.constant 0 : index
    %4 = vector.load %arg3[%c0_2, %c0_3] : memref<16x128xbf16, #tpu.memory_space<vmem>>, vector<16x128xbf16>
    %c0_4 = arith.constant 0 : index
    %c0_5 = arith.constant 0 : index
    %5 = vector.load %arg4[%c0_4, %c0_5] : memref<128x128xbf16, #tpu.memory_space<vmem>>, vector<128x128xbf16>
    %cst = arith.constant dense<0.000000e+00> : vector<16x128xf32>
    %6 = tpu.matmul %4, %5, %cst {dimension_numbers = #tpu.dot_dimension_numbers<[1], [0], [0], [1], [0, 0, 1, 1], [], []>} : vector<16x128xbf16>, vector<128x128xbf16>, vector<16x128xf32> -> vector<16x128xf32>
    %7 = arith.addf %3, %6 : vector<16x128xf32>
    %c0_6 = arith.constant 0 : index
    %c0_7 = arith.constant 0 : index
    %8 = vector.load %arg9[%c0_6, %c0_7] : memref<16x128xf32, #tpu.memory_space<vmem>>, vector<16x128xf32>
    tpu.vector_store %arg9[%c0_6, %c0_7], %7 {strides = array<i32>} : memref<16x128xf32, #tpu.memory_space<vmem>>, vector<16x128xf32>,
    %c0_i32_8 = arith.constant 0 : i32
    %9 = arith.cmpi eq, %arg2, %c0_i32_8 : i32
    %10 = arith.extui %9 : i1 to i32
    %c0_i32_9 = arith.constant 0 : i32
    %11 = arith.cmpi ne, %10, %c0_i32_9 : i32
    scf.if %11 {
      %c0_10 = arith.constant 0 : index
      %c0_11 = arith.constant 0 : index
      %12 = vector.load %arg5[%c0_10, %c0_11] : memref<16x16xbf16, #tpu.memory_space<vmem>>, vector<16x16xbf16>
      %c0_12 = arith.constant 0 : index
      %c0_13 = arith.constant 0 : index
      %13 = vector.load %arg6[%c0_12, %c0_13] : memref<16x128xbf16, #tpu.memory_space<vmem>>, vector<16x128xbf16>
      %cst_14 = arith.constant dense<0.000000e+00> : vector<16x128xf32>
      %14 = tpu.matmul %12, %13, %cst_14 {dimension_numbers = #tpu.dot_dimension_numbers<[1], [0], [0], [1], [0, 0, 1, 1], [], []>} : vector<16x16xbf16>, vector<16x128xbf16>, vector<16x128xf32> -> vector<16x128xf32>
      %c0_15 = arith.constant 0 : index
      %c0_16 = arith.constant 0 : index
      %15 = vector.load %arg9[%c0_15, %c0_16] : memref<16x128xf32, #tpu.memory_space<vmem>>, vector<16x128xf32>
      %16 = arith.addf %15, %14 : vector<16x128xf32>
      %c0_17 = arith.constant 0 : index
      %c0_18 = arith.constant 0 : index
      %17 = vector.load %arg7[%c0_17, %c0_18] : memref<16x1xf32, #tpu.memory_space<vmem>>, vector<16x1xf32>
      %18 = vector.broadcast %17 : vector<16x1xf32> to vector<16x128xf32>
      %19 = arith.mulf %16, %18 : vector<16x128xf32>
      %20 = arith.truncf %19 : vector<16x128xf32> to vector<16x128xbf16>
      %c0_19 = arith.constant 0 : index
      %c0_20 = arith.constant 0 : index
      %21 = vector.load %arg8[%c0_19, %c0_20] : memref<16x128xbf16, #tpu.memory_space<vmem>>, vector<16x128xbf16>
      tpu.vector_store %arg8[%c0_19, %c0_20], %20 {strides = array<i32>} : memref<16x128xbf16, #tpu.memory_space<vmem>>, vector<16x128xbf16>,
    } else {
    }
    return
  }
  func.func @transform_0(%arg0: i32, %arg1: i32, %arg2: i32) -> (i32, i32) {
    %c0_i32 = arith.constant 0 : i32
    return %arg0, %arg2 : i32, i32
  }
  func.func @transform_1(%arg0: i32, %arg1: i32, %arg2: i32) -> (i32, i32) {
    %c0_i32 = arith.constant 0 : i32
    return %arg2, %arg1 : i32, i32
  }
  func.func @transform_2(%arg0: i32, %arg1: i32, %arg2: i32) -> (i32, i32) {
    %c0_i32 = arith.constant 0 : i32
    %c0_i32_0 = arith.constant 0 : i32
    return %arg0, %c0_i32 : i32, i32
  }
  func.func @transform_3(%arg0: i32, %arg1: i32, %arg2: i32) -> (i32, i32) {
    %c0_i32 = arith.constant 0 : i32
    %c0_i32_0 = arith.constant 0 : i32
    return %c0_i32, %arg1 : i32, i32
  }
  func.func @transform_4(%arg0: i32, %arg1: i32, %arg2: i32) -> (i32, i32) {
    %c0_i32 = arith.constant 0 : i32
    %c0_i32_0 = arith.constant 0 : i32
    return %arg0, %c0_i32 : i32, i32
  }
  func.func @transform_5(%arg0: i32, %arg1: i32, %arg2: i32) -> (i32, i32) {
    %c0_i32 = arith.constant 0 : i32
    return %arg0, %arg1 : i32, i32
  }
}

</mosaic_0001>

<bundles_post_ra>
// kernel: tpu_custom_call.1
= control target key start
LH: loop header
LB: loop body
LE: loop exit
PB: predicated region body
PF: predicated region fallthrough
CT: control target
= control target key end

     0   :  { %10 = vsyncpa [#allocation4], 0  ;;  %s478_s0 = inlined_call_operand.vmem [shape: bf16[16,128], index: 0, kind: input, shape index: {}]   ;;  %s479_s1 = inlined_call_operand.hbm [shape: bf16[128,128], index: 1, kind: input, shape index: {}]   ;;  %s480_s2 = inlined_call_operand.vmem [shape: bf16[16,16], index: 2, kind: input, shape index: {}]   ;;  %s481_s3 = inlined_call_operand.vmem [shape: bf16[16,128], index: 3, kind: input, shape index: {}]   ;;  %s482_s4 = inlined_call_operand.vmem [shape: f32[16,1], index: 4, kind: input, shape index: {}]   ;;  %s483_s5 = inlined_call_operand.hbm [shape: bf16[16,128], index: 5, kind: output, shape index: {}]  }
   0x1   :  { %11 = vsyncpa [#allocation5], 0  ;;  %s396_s18 = smov [#allocation3]   ;;  %s348_s22 = scalar_lea.hbm %s479_s1, 1024 }
   0x2   :  { %s19_s19 = sshll.u32 %s396_s18, 4  ;;  %p349_p0 = scmp.ne.s32.totalorder %s479_s1, %s348_s22  ;;  %s20_s19 = int_to_ptr.vmem [resolvable:$true] %s19_s19 }
   0x3   :  { %p352_p1 = scmp.lt.u32.totalorder %s348_s22, %s479_s1 }
   0x5   :  { %p354_p2 = pnand %p352_p1, %p349_p0 }
   0x7   :  { %357 = shalt.err (!%p354_p2)
}
   0x8   :  { %s358_s27 = scalar_lea.vmem %s20_s19, 1024  ;;  %p363_p4 = scmp.lt.s32.totalorder %s20_s19, %s20_s19 }
   0x9   :  { %p359_p3 = scmp.ne.s32.totalorder %s20_s19, %s358_s27  ;;  %p364_p5 = scmp.lt.s32.totalorder %s358_s27, %s358_s27 }
   0xb   :  { %p365_p6 = por %p364_p5, %p363_p4 }
   0xd   :  { %p366_p7 = pnand %p365_p6, %p359_p3 }
   0xf   :  { %369 = shalt.err (!%p366_p7)
}
  0x10   :  { %s397_s28 = smov 64   ;;  %s398_s29 = smov 4  }
  0x11   :  { %25 = dma.hbm_to_vmem [thread:$0]  %s479_s1, 1024, %s20_s19, [#allocation4], %s397_s28, %s397_s28, %s398_s29  }
  0x12   :  { %392 = dma.done.wait [#allocation4], 1024  }
  0x13   :  { %393 = vsyncadd [#allocation4], 4294966272  ;;  %v399_v0 = vmov 0.0   ;;  %vm400_vm0 = vmmov 0   ;;  %v401_v1 = vmov 0   ;;  %v337_v2 = vld [vmem:[#allocation3] sm:$0xff]  }
  0x14   :  { %301 = vmatprep.subr.bf16.mxu1 %v399_v0  ;;  %321 = vmatprep.subr.bf16.mxu0 %v399_v0  ;;  %v338_v3 = vld [vmem:[#allocation3 + $0x8] sm:$0xff]   ;;  %v339_v4 = vld [vmem:[#allocation3 + $0x10] sm:$0xff]   ;;  %v344_v5 = vld [vmem:[%s481_s3] sm:$0xff]   ;;  %vm179_vm1 = vcmask 130048  }
  0x15   :  { %323 = vmatprep.mubr.msk.bf16.mxu0 %vm400_vm0, %v399_v0  ;;  %317 = vmatprep.mubr.msk.bf16.mxu1 %vm400_vm0, %v399_v0  ;;  %v346_v6 = vld [vmem:[%s480_s2] sm:$0xff]   ;;  %v340_v7 = vld [vmem:[#allocation3 + $0x18] sm:$0xff]   ;;  %v229_v9 = vld [vmem:[%s482_s4 + $0x8] sm:$0xff] }
  0x16   :  { %336 = vset.pattern.permute.xlu0 %v401_v1  ;;  %302 = vmatpush3.bf16.msra.mxu1 %v337_v2  ;;  %v228_v8 = vld [vmem:[%s482_s4] sm:$0xff]  ;;  %v342_v11 = vld [vmem:[#allocation3 + $0x28] sm:$0xff]   ;;  %v343_v12 = vld [vmem:[#allocation3 + $0x30] sm:$0xff]   ;;  %s402_s4 = smov [#allocation6]  }
  0x17   :  { %303 = vmatprep.subr.bf16.mxu1 %v399_v0  ;;  %322 = vmatpush3.bf16.msra.mxu0 %v344_v5  ;;  %v341_v10 = vld [vmem:[#allocation3 + $0x20] sm:$0xff]   ;;  %v345_v13 = vld [vmem:[#allocation3 + $0x38] sm:$0xff]   ;;  %s257_s14 = sshll.u32 %s402_s4, 4  ;;  %s258_s14 = int_to_ptr.vmem [resolvable:$true] %s257_s14 }
  0x18   :  { %232 = vperm.xlu0 %336, %v228_v8   ;;  %v347_v14 = vld [vmem:[%s478_s0] sm:$0xff]   ;;  %s370_s0 = scalar_lea.vmem %s258_s14, 128  ;;  %p375_p9 = scmp.lt.s32.totalorder %s258_s14, %s258_s14 }
  0x19   :  { %p371_p8 = scmp.ne.s32.totalorder %s258_s14, %s370_s0  ;;  %p376_p10 = scmp.lt.s32.totalorder %s370_s0, %s370_s0 }
  0x1a   :  { %304 = vmatpush3.bf16.msra.mxu1 %v338_v3  ;;  %324 = vmatmul.mubr.msk.bf16.vlgmr.msra.gmra.mrb[0].mxu0 %vm179_vm1, %v346_v6 }
  0x1b   :  { %305 = vmatprep.subr.bf16.mxu1 %v399_v0  ;;  %p377_p11 = por %p376_p10, %p375_p9 }
  0x1c   :  { %237 = vperm.xlu0 %336, %v229_v9  }
  0x1d   :  { %p378_p12 = pnand %p377_p11, %p371_p8 }
  0x1e   :  { %306 = vmatpush3.bf16.msra.mxu1 %v339_v4 }
  0x1f   :  { %307 = vmatprep.subr.bf16.mxu1 %v399_v0 }
  0x22   :  { %308 = vmatpush3.bf16.msra.mxu1 %v340_v7 }
  0x23   :  { %309 = vmatprep.subr.bf16.mxu1 %v399_v0 }
  0x26   :  { %310 = vmatpush3.bf16.msra.mxu1 %v341_v10 }
  0x27   :  { %311 = vmatprep.subr.bf16.mxu1 %v399_v0 }
  0x2a   :  { %312 = vmatpush3.bf16.msra.mxu1 %v342_v11 }
  0x2b   :  { %313 = vmatprep.subr.bf16.mxu1 %v399_v0 }
  0x2e   :  { %314 = vmatpush3.bf16.msra.mxu1 %v343_v12 }
  0x2f   :  { %315 = vmatprep.subr.bf16.mxu1 %v399_v0 }
  0x32   :  { %316 = vmatpush3.bf16.msra.mxu1 %v345_v13 }
  0x35   :  { %318 = vmatmul.mubr.bf16.vlgmr.msra.gmra.mrb[0].mxu1 %v347_v14 }
  0x97   :  { %v233_v19 = vpop.permute.xlu0 %232 }
  0x9b   :  { %v238_v26 = vpop.permute.xlu0 %237 }
  0xed   :  { %v217_v15 = vpop.f32.mrb[0].mxu0 }
  0xee   :  { %v325_v16 = vpop.f32.mrb[1].mxu0 }
  0xef   :  { %v220_v17 = vpop.f32.mrb[2].mxu0 }
  0xf0   :  { %v326_v18 = vpop.f32.mrb[3].mxu0 }
 0x108   :  { %v150_v20 = vpop.f32.mrb[0].mxu1 }
 0x109   :  { %v226_v21 = vadd.f32 %v217_v15, %v150_v20  ;;  %v319_v22 = vpop.f32.mrb[1].mxu1 }
 0x10a   :  { %v153_v23 = vpop.f32.mrb[2].mxu1 }
 0x10b   :  { %v227_v24 = vadd.f32 %v220_v17, %v153_v23  ;;  %v320_v25 = vpop.f32.mrb[3].mxu1  ;;  %v240_v27 = vmul.f32 %v233_v19, %v226_v21 }
 0x10d   :  { %v241_v28 = vmul.f32 %v238_v26, %v227_v24 }
 0x10f   :  { %v288_v29 = vpack.c.bf16 %v241_v28, %v240_v27 }
 0x111   :  { %289 = vst [vmem:[#allocation6] sm:$0xff] %v288_v29  }
 0x112   :  { %381 = shalt.err (!%p378_p12)
}
 0x113   :  { %s382_s17 = scalar_lea.hbm %s483_s5, 128 }
 0x114   :  { %p383_p13 = scmp.ne.s32.totalorder %s483_s5, %s382_s17  ;;  %p386_p0 = scmp.lt.u32.totalorder %s382_s17, %s483_s5 }
 0x116   :  { %p388_p1 = pnand %p386_p0, %p383_p13 }
 0x118   :  { %391 = shalt.err (!%p388_p1)
}
 0x119   :  { %263 = dma.vmem_to_hbm [thread:$0]  %s258_s14, 128, %s483_s5, [#allocation5], %s397_s28, %s397_s28, %s398_s29  }
 0x11a   :  { %394 = dma.done.wait [#allocation5], 128  }
 0x11b   :  { %395 = vsyncadd [#allocation5], 4294967168 }
 0x11c   :  { %267 = vsyncpa [#allocation4], 1 }
 0x11d   :  { %268 = vsyncpa [#allocation5], 1 }

</bundles_post_ra>
